<compile_context>
chip_gen: v5e
topology: v5e:2x2
jax: 0.10.0
libtpu: 0.0.40
codegen_flags: <defaults>
</compile_context>

<pallas_src>
import functools

import jax
import jax.numpy as jnp
from jax.experimental import pallas as pl
from jax.experimental.pallas import tpu as pltpu


# x (f32 bytes) at or below this -> fused single-pass kernel (whole x resident).
_FUSED_VMEM_BYTES = 4 << 20          # 4 MiB (conservative across v5e/v6e/v7x)
# Target per-grid-step x-block size for the two-pass path (double-buffered
# in + out stays well under the default scoped-VMEM limit on all chips).
_TWO_PASS_BLOCK_BYTES = 2 << 20      # 2 MiB


# --------------------------------------------------------------------------
# Kernels
# --------------------------------------------------------------------------
def _fused_kernel(x_ref, gamma_ref, beta_ref, p_ref, o_ref, *, count, eps):
    """Single pass: stats + normalize + affine + temporal scale, x resident."""
    xb = x_ref[...].astype(jnp.float32)                      # (T, C, NL)
    s = jnp.sum(xb, axis=(0, 2))[None, :, None]              # (1, C, 1)
    sq = jnp.sum(xb * xb, axis=(0, 2))[None, :, None]        # (1, C, 1)
    mean = s / count
    var = jnp.maximum(sq / count - mean * mean, 0.0)         # biased, clamped
    inv = jax.lax.rsqrt(var + eps)
    scale = gamma_ref[...][None] * inv                       # (1, C, 1)
    shift = beta_ref[...][None] - mean * scale               # (1, C, 1)
    pt = p_ref[...][:, :, None]                              # (T, 1, 1)
    o_ref[...] = ((xb * scale + shift) * pt).astype(o_ref.dtype)


def _stats_kernel(x_ref, sum_ref, sq_ref):
    """Per-channel partial sum / sum-of-squares; one partial row per core."""
    @pl.when(jnp.logical_and(pl.program_id(1) == 0, pl.program_id(2) == 0))
    def _():
        sum_ref[...] = jnp.zeros_like(sum_ref)
        sq_ref[...] = jnp.zeros_like(sq_ref)

    xb = x_ref[...].astype(jnp.float32)                      # (Tb, C, NLb)
    sum_ref[...] += jnp.sum(xb, axis=(0, 2))[None, None, :]  # (1, 1, C)
    sq_ref[...] += jnp.sum(xb * xb, axis=(0, 2))[None, None, :]


def _apply_kernel(x_ref, a_ref, b_ref, o_ref):
    """y = x * a + b with a, b already folding gamma/beta/mean/var and p[t]."""
    xb = x_ref[...].astype(jnp.float32)                      # (Tb, C, NLb)
    o_ref[...] = (xb * a_ref[...] + b_ref[...]).astype(o_ref.dtype)


# --------------------------------------------------------------------------
# Block-size selection for the two-pass path
# --------------------------------------------------------------------------
def _choose_blocks(T, C, NL, *, block_t=None, block_nl=None):
    """Pick (tb, nl_b): tb | T, nl_b | NL, nl_b == NL or nl_b % 128 == 0."""
    budget = _TWO_PASS_BLOCK_BYTES

    # ---- lane-axis tile -----------------------------------------------------
    if block_nl is not None:
        nl_b = block_nl
        assert NL % nl_b == 0, "block_nl must divide N*L"
        assert nl_b == NL or nl_b % 128 == 0, \
            "block_nl must be N*L or a multiple of 128"
    else:
        nl_b = NL
        if C * NL * 4 > budget and NL % 128 == 0:
            # A single timestep does not fit -> tile the lane axis with the
            # largest 128-multiple divisor of NL that fits the budget.
            cap = max(128, (budget // (4 * C)) // 128 * 128)
            cand = cap
            while cand >= 128:
                if NL % cand == 0:
                    nl_b = cand
                    break
                cand -= 128
        # If NL is not 128-divisible we keep the full lane extent (correctness
        # first; the block may exceed the soft budget for extreme shapes).

    # ---- time-axis tile -----------------------------------------------------
    if block_t is not None:
        tb = block_t
        assert T % tb == 0, "block_t must divide T"
    else:
        per_t = max(C * nl_b * 4, 1)
        tb = max(1, min(T, budget // per_t))
        while T % tb != 0:
            tb -= 1
    return tb, nl_b


# --------------------------------------------------------------------------
# Wrapper
# --------------------------------------------------------------------------
def tebn_forward(x, gamma, beta, p, eps=1e-5, *, force_two_pass=False,
                 block_t=None, block_nl=None):
    """x: [T, N, C, L]; gamma, beta: [C]; p: [T, 1, 1, 1]."""
    T, N, C, L = x.shape
    NL = N * L
    count = float(T * NL)
    out_dtype = x.dtype

    # Lane-dense layout: [T, N, C, L] -> [T, C, N*L]  (C on sublanes, N*L on lanes).
    x2 = jnp.transpose(x, (0, 2, 1, 3)).reshape(T, C, NL)

    x_bytes_f32 = T * C * NL * 4
    use_fused = (not force_two_pass) and (x_bytes_f32 <= _FUSED_VMEM_BYTES)

    if use_fused:
        gamma2 = gamma.reshape(C, 1).astype(jnp.float32)
        beta2 = beta.reshape(C, 1).astype(jnp.float32)
        p2 = p.reshape(T, 1).astype(jnp.float32)
        y2 = pl.pallas_call(
            functools.partial(_fused_kernel, count=count, eps=eps),
            out_shape=jax.ShapeDtypeStruct((T, C, NL), out_dtype),
            grid=(1,),
            in_specs=[
                pl.BlockSpec((T, C, NL), lambda i: (0, 0, 0)),
                pl.BlockSpec((C, 1), lambda i: (0, 0)),
                pl.BlockSpec((C, 1), lambda i: (0, 0)),
                pl.BlockSpec((T, 1), lambda i: (0, 0)),
            ],
            out_specs=pl.BlockSpec((T, C, NL), lambda i: (0, 0, 0)),
            compiler_params=pltpu.CompilerParams(
                dimension_semantics=("arbitrary",)),
        )(x2, gamma2, beta2, p2)
    else:
        tb, nl_b = _choose_blocks(T, C, NL, block_t=block_t, block_nl=block_nl)
        n_t = T // tb
        n_l = NL // nl_b
        ncores = 2 if (n_t >= 2 and n_t % 2 == 0) else 1
        inner = n_t // ncores

        # --- pass 1: per-core partial per-channel sum / sumsq ----------------
        partial_sum, partial_sq = pl.pallas_call(
            _stats_kernel,
            out_shape=(jax.ShapeDtypeStruct((ncores, 1, C), jnp.float32),
                       jax.ShapeDtypeStruct((ncores, 1, C), jnp.float32)),
            grid=(ncores, inner, n_l),
            in_specs=[pl.BlockSpec((tb, C, nl_b),
                                   lambda c, i, j: (c * inner + i, 0, j))],
            out_specs=(pl.BlockSpec((1, 1, C), lambda c, i, j: (c, 0, 0)),
                       pl.BlockSpec((1, 1, C), lambda c, i, j: (c, 0, 0))),
            compiler_params=pltpu.CompilerParams(
                dimension_semantics=("parallel", "arbitrary", "arbitrary")),
        )(x2)

        # --- finalize normalization constants (tiny JAX ops) -----------------
        s = jnp.sum(partial_sum, axis=(0, 1))                 # (C,)
        sq = jnp.sum(partial_sq, axis=(0, 1))                 # (C,)
        mean = s / count
        var = jnp.maximum(sq / count - mean * mean, 0.0)      # biased, clamped
        inv = jax.lax.rsqrt(var + eps)
        scale = gamma.astype(jnp.float32) * inv               # (C,)
        shift = beta.astype(jnp.float32) - mean * scale       # (C,)
        pt = p.reshape(T).astype(jnp.float32)                 # (T,)
        a = (pt[:, None] * scale[None, :]).reshape(T, C, 1)   # fold p[t] in
        b = (pt[:, None] * shift[None, :]).reshape(T, C, 1)

        # --- pass 2: fused multiply-add, (tb, C, nl_b) blocks -----------------
        y2 = pl.pallas_call(
            _apply_kernel,
            out_shape=jax.ShapeDtypeStruct((T, C, NL), out_dtype),
            grid=(n_t, n_l),
            in_specs=[
                pl.BlockSpec((tb, C, nl_b), lambda i, j: (i, 0, j)),
                pl.BlockSpec((tb, C, 1), lambda i, j: (i, 0, 0)),
                pl.BlockSpec((tb, C, 1), lambda i, j: (i, 0, 0)),
            ],
            out_specs=pl.BlockSpec((tb, C, nl_b), lambda i, j: (i, 0, j)),
            compiler_params=pltpu.CompilerParams(
                dimension_semantics=("parallel", "parallel")),
        )(x2, a, b)

    # Back to the original [T, N, C, L] layout.
    return jnp.transpose(y2.reshape(T, C, N, L), (0, 2, 1, 3))


def tebn_reference(x, gamma, beta, p, eps=1e-5):
    """Pure-JAX reference of the PyTorch forward (training-mode BN)."""
    T, N, C, L = x.shape
    xf = x.reshape(T * N, C, L).astype(jnp.float32)
    mean = jnp.mean(xf, axis=(0, 2))
    var = jnp.mean((xf - mean[None, :, None]) ** 2, axis=(0, 2))  # biased
    xn = (xf - mean[None, :, None]) * jax.lax.rsqrt(var + eps)[None, :, None]
    y = xn * gamma[None, :, None] + beta[None, :, None]
    return y.reshape(T, N, C, L) * p.reshape(T, 1, 1, 1)


if __name__ == "__main__":
    # Small shapes consistent with the module: T timesteps, BatchNorm1d input (N, C, L).
    T, N, C, L = 8, 2, 4, 16
    key = jax.random.PRNGKey(0)
    kx, kg, kb, kp = jax.random.split(key, 4)

    x = jax.random.normal(kx, (T, N, C, L), dtype=jnp.float32)
    # Deterministic synthetic parameters (shapes per __init__: bn.weight/bias [C], p [T,1,1,1]).
    gamma = 1.0 + 0.1 * jax.random.normal(kg, (C,), dtype=jnp.float32)
    beta = 0.1 * jax.random.normal(kb, (C,), dtype=jnp.float32)
    p = 1.0 + 0.1 * jax.random.normal(kp, (T, 1, 1, 1), dtype=jnp.float32)

    y_ref = tebn_reference(x, gamma, beta, p)

    # Fused single-pass path (default for small, VMEM-resident inputs).
    y_fused = jax.block_until_ready(tebn_forward(x, gamma, beta, p))
    assert y_fused.shape == (T, N, C, L)
    assert jnp.allclose(y_fused, y_ref, rtol=1e-3, atol=1e-3), "fused mismatch"

    # Two-pass tiled path (time-blocked): Tb=2 -> 4 time-blocks -> 2-way
    # parallel stats grid + accumulation.
    y_two = jax.block_until_ready(
        tebn_forward(x, gamma, beta, p, force_two_pass=True, block_t=2))
    assert y_two.shape == (T, N, C, L)
    assert jnp.allclose(y_two, y_ref, rtol=1e-3, atol=1e-3), "two-pass mismatch"

    # Two-pass tiled path with lane tiling exercised (NL = 256, block_nl = 128),
    # verifying the large-timestep code path on a small, 128-aligned shape.
    T2, N2, C2, L2 = 4, 2, 4, 128
    kx2 = jax.random.PRNGKey(1)
    x2 = jax.random.normal(kx2, (T2, N2, C2, L2), dtype=jnp.float32)
    gamma2 = gamma[:C2]
    beta2 = beta[:C2]
    p2 = p[:T2]
    y_ref2 = tebn_reference(x2, gamma2, beta2, p2)
    y_lane = jax.block_until_ready(
        tebn_forward(x2, gamma2, beta2, p2, force_two_pass=True,
                     block_t=2, block_nl=128))
    assert y_lane.shape == (T2, N2, C2, L2)
    assert jnp.allclose(y_lane, y_ref2, rtol=1e-3, atol=1e-3), "lane-tiled mismatch"

    print("KERNEL_OK")
</pallas_src>

<mosaic_0001>
module attributes {stable_mosaic.version = 11 : i64} {
  func.func @_fused_kernel(%arg0: i32, %arg1: memref<8x4x32xf32, #tpu.memory_space<vmem>>, %arg2: memref<4x1xf32, #tpu.memory_space<vmem>>, %arg3: memref<4x1xf32, #tpu.memory_space<vmem>>, %arg4: memref<8x1xf32, #tpu.memory_space<vmem>>, %arg5: memref<8x4x32xf32, #tpu.memory_space<vmem>>) attributes {dimension_semantics = [#tpu.dimension_semantics<arbitrary>], iteration_bounds = array<i64: 1>, scalar_prefetch = 0 : i64, scratch_operands = 0 : i64, tpu.core_type = #tpu.core_type<tc>, window_params = [{pipeline_mode = #tpu.pipeline_mode<synchronous>, transform_indices = @transform_0, window_bounds = array<i64: 8, 4, 32>}, {pipeline_mode = #tpu.pipeline_mode<synchronous>, transform_indices = @transform_1, window_bounds = array<i64: 4, 1>}, {pipeline_mode = #tpu.pipeline_mode<synchronous>, transform_indices = @transform_2, window_bounds = array<i64: 4, 1>}, {pipeline_mode = #tpu.pipeline_mode<synchronous>, transform_indices = @transform_3, window_bounds = array<i64: 8, 1>}, {pipeline_mode = #tpu.pipeline_mode<synchronous>, transform_indices = @transform_4, window_bounds = array<i64: 8, 4, 32>}]} {
    %c0 = arith.constant 0 : index
    %c0_0 = arith.constant 0 : index
    %c0_1 = arith.constant 0 : index
    %0 = vector.load %arg1[%c0, %c0_0, %c0_1] : memref<8x4x32xf32, #tpu.memory_space<vmem>>, vector<8x4x32xf32>
    %cst = arith.constant dense<0.000000e+00> : vector<4xf32>
    %1 = vector.multi_reduction <add>, %0, %cst [0, 2] : vector<8x4x32xf32> to vector<4xf32>
    %2 = vector.shape_cast %1 : vector<4xf32> to vector<1x4x1xf32>
    %3 = arith.mulf %0, %0 : vector<8x4x32xf32>
    %cst_2 = arith.constant dense<0.000000e+00> : vector<4xf32>
    %4 = vector.multi_reduction <add>, %3, %cst_2 [0, 2] : vector<8x4x32xf32> to vector<4xf32>
    %5 = vector.shape_cast %4 : vector<4xf32> to vector<1x4x1xf32>
    %cst_3 = arith.constant 2.560000e+02 : f32
    %6 = vector.broadcast %cst_3 : f32 to vector<1x4x1xf32>
    %7 = arith.divf %2, %6 : vector<1x4x1xf32>
    %cst_4 = arith.constant 2.560000e+02 : f32
    %8 = vector.broadcast %cst_4 : f32 to vector<1x4x1xf32>
    %9 = arith.divf %5, %8 : vector<1x4x1xf32>
    %10 = arith.mulf %7, %7 : vector<1x4x1xf32>
    %11 = arith.subf %9, %10 : vector<1x4x1xf32>
    %cst_5 = arith.constant 0.000000e+00 : f32
    %12 = vector.broadcast %cst_5 : f32 to vector<1x4x1xf32>
    %13 = arith.maximumf %11, %12 : vector<1x4x1xf32>
    %cst_6 = arith.constant 9.99999974E-6 : f32
    %14 = vector.broadcast %cst_6 : f32 to vector<1x4x1xf32>
    %15 = arith.addf %13, %14 : vector<1x4x1xf32>
    %16 = math.rsqrt %15 : vector<1x4x1xf32>
    %c0_7 = arith.constant 0 : index
    %c0_8 = arith.constant 0 : index
    %17 = vector.load %arg2[%c0_7, %c0_8] : memref<4x1xf32, #tpu.memory_space<vmem>>, vector<4x1xf32>
    %18 = vector.shape_cast %17 : vector<4x1xf32> to vector<1x4x1xf32>
    %19 = arith.mulf %18, %16 : vector<1x4x1xf32>
    %c0_9 = arith.constant 0 : index
    %c0_10 = arith.constant 0 : index
    %20 = vector.load %arg3[%c0_9, %c0_10] : memref<4x1xf32, #tpu.memory_space<vmem>>, vector<4x1xf32>
    %21 = vector.shape_cast %20 : vector<4x1xf32> to vector<1x4x1xf32>
    %22 = arith.mulf %7, %19 : vector<1x4x1xf32>
    %23 = arith.subf %21, %22 : vector<1x4x1xf32>
    %c0_11 = arith.constant 0 : index
    %c0_12 = arith.constant 0 : index
    %24 = vector.load %arg4[%c0_11, %c0_12] : memref<8x1xf32, #tpu.memory_space<vmem>>, vector<8x1xf32>
    %25 = vector.shape_cast %24 : vector<8x1xf32> to vector<8x1x1xf32>
    %26 = vector.broadcast %19 : vector<1x4x1xf32> to vector<8x4x32xf32>
    %27 = arith.mulf %0, %26 : vector<8x4x32xf32>
    %28 = vector.broadcast %23 : vector<1x4x1xf32> to vector<8x4x32xf32>
    %29 = arith.addf %27, %28 : vector<8x4x32xf32>
    %30 = vector.broadcast %25 : vector<8x1x1xf32> to vector<8x4x32xf32>
    %31 = arith.mulf %29, %30 : vector<8x4x32xf32>
    %c0_13 = arith.constant 0 : index
    %c0_14 = arith.constant 0 : index
    %c0_15 = arith.constant 0 : index
    %32 = vector.load %arg5[%c0_13, %c0_14, %c0_15] : memref<8x4x32xf32, #tpu.memory_space<vmem>>, vector<8x4x32xf32>
    tpu.vector_store %arg5[%c0_13, %c0_14, %c0_15], %31 {strides = array<i32>} : memref<8x4x32xf32, #tpu.memory_space<vmem>>, vector<8x4x32xf32>,
    return
  }
  func.func @transform_0(%arg0: i32) -> (i32, i32, i32) {
    %c0_i32 = arith.constant 0 : i32
    %c0_i32_0 = arith.constant 0 : i32
    %c0_i32_1 = arith.constant 0 : i32
    %c0_i32_2 = arith.constant 0 : i32
    return %c0_i32, %c0_i32_0, %c0_i32_1 : i32, i32, i32
  }
  func.func @transform_1(%arg0: i32) -> (i32, i32) {
    %c0_i32 = arith.constant 0 : i32
    %c0_i32_0 = arith.constant 0 : i32
    %c0_i32_1 = arith.constant 0 : i32
    return %c0_i32, %c0_i32_0 : i32, i32
  }
  func.func @transform_2(%arg0: i32) -> (i32, i32) {
    %c0_i32 = arith.constant 0 : i32
    %c0_i32_0 = arith.constant 0 : i32
    %c0_i32_1 = arith.constant 0 : i32
    return %c0_i32, %c0_i32_0 : i32, i32
  }
  func.func @transform_3(%arg0: i32) -> (i32, i32) {
    %c0_i32 = arith.constant 0 : i32
    %c0_i32_0 = arith.constant 0 : i32
    %c0_i32_1 = arith.constant 0 : i32
    return %c0_i32, %c0_i32_0 : i32, i32
  }
  func.func @transform_4(%arg0: i32) -> (i32, i32, i32) {
    %c0_i32 = arith.constant 0 : i32
    %c0_i32_0 = arith.constant 0 : i32
    %c0_i32_1 = arith.constant 0 : i32
    %c0_i32_2 = arith.constant 0 : i32
    return %c0_i32, %c0_i32_0, %c0_i32_1 : i32, i32, i32
  }
}

</mosaic_0001>

<bundles_post_ra>
// kernel: tpu_custom_call.1
= control target key start
LH: loop header
LB: loop body
LE: loop exit
PB: predicated region body
PF: predicated region fallthrough
CT: control target
= control target key end

     0   :  { %9 = vsyncpa [#allocation3], 0  ;;  %s412_s0 = inlined_call_operand.hbm [shape: f32[8,4,32], index: 0, kind: input, shape index: {}]   ;;  %s413_s1 = inlined_call_operand.vmem [shape: f32[4,1], index: 1, kind: input, shape index: {}]   ;;  %s414_s2 = inlined_call_operand.vmem [shape: f32[4,1], index: 2, kind: input, shape index: {}]   ;;  %s415_s3 = inlined_call_operand.vmem [shape: f32[8,1], index: 3, kind: input, shape index: {}]   ;;  %s416_s4 = inlined_call_operand.hbm [shape: f32[8,4,32], index: 4, kind: output, shape index: {}]  }
   0x1   :  { %10 = vsyncpa [#allocation4], 0  ;;  %s15_s17 = sshll.u32 %s412_s0, 4  ;;  %s288_s18 = smov [#allocation2]   ;;  %s16_s17 = int_to_ptr.hbm [resolvable:$true] %s15_s17 }
   0x2   :  { %s17_s19 = sshll.u32 %s288_s18, 4  ;;  %s289_s20 = smov 64   ;;  %s18_s19 = int_to_ptr.vmem [resolvable:$true] %s17_s19 }
   0x3   :  { %s290_s21 = smov 4  }
   0x4   :  { %23 = dma.hbm_to_vmem [thread:$0]  %s16_s17, 512, %s18_s19, [#allocation3], %s289_s20, %s289_s20, %s290_s21  }
   0x5   :  { %284 = dma.done.wait [#allocation3], 512  }
   0x6   :  { %285 = vsyncadd [#allocation3], 4294966784  ;;  %vm42_vm0 = vcmask 257024   ;;  %v325_v0 = vld [vmem:[#allocation2] sm:$0xf]  ;;  %v291_v47 = vmov 256.0  }
   0x7   :  { %v327_v1 = vld [vmem:[#allocation2 + $0x4] sm:$0xf]  ;;  %v329_v2 = vld [vmem:[#allocation2 + $0x8] sm:$0xf]  ;;  %v331_v3 = vld [vmem:[#allocation2 + $0xc] sm:$0xf]  ;;  %v60_v4 = vmul.f32 %v325_v0, %v325_v0  ;;  %232 = vrcp.f32 %v291_v47 }
   0x8   :  { %v43_v5 = vsel %vm42_vm0, %v325_v0, 0.0  ;;  %v44_v6 = vsel %vm42_vm0, %v327_v1, 0.0  ;;  %v61_v7 = vmul.f32 %v327_v1, %v327_v1  ;;  %v62_v8 = vmul.f32 %v329_v2, %v329_v2  ;;  %v343_v9 = vld [vmem:[#allocation2 + $0x10] sm:$0xf]  ;;  %v351_v14 = vld [vmem:[#allocation2 + $0x14] sm:$0xf] }
   0x9   :  { %v45_v10 = vadd.f32 %v44_v6, %v43_v5  ;;  %v46_v11 = vsel %vm42_vm0, %v329_v2, 0.0  ;;  %v48_v12 = vsel %vm42_vm0, %v331_v3, 0.0  ;;  %v63_v13 = vmul.f32 %v331_v3, %v331_v3  ;;  %v360_v21 = vld [vmem:[#allocation2 + $0x18] sm:$0xf]  ;;  %v367_v27 = vld [vmem:[#allocation2 + $0x1c] sm:$0xf] }
   0xa   :  { %v68_v16 = vsel %vm42_vm0, %v60_v4, 0.0  ;;  %v50_v17 = vsel %vm42_vm0, %v343_v9, 0.0  ;;  %v64_v18 = vmul.f32 %v343_v9, %v343_v9  ;;  %v69_v19 = vsel %vm42_vm0, %v61_v7, 0.0  ;;  %v113_v46 = vld [vmem:[%s415_s3] sm:$0xff]  ;;  %s210_s28 = sshll.u32 %s416_s4, 4  ;;  %s211_s28 = int_to_ptr.hbm [resolvable:$true] %s210_s28 }
   0xb   :  { %v47_v15 = vadd.f32 %v46_v11, %v45_v10  ;;  %v71_v20 = vsel %vm42_vm0, %v62_v8, 0.0  ;;  %v70_v23 = vadd.f32 %v69_v19, %v68_v16  ;;  %v52_v24 = vsel %vm42_vm0, %v351_v14, 0.0 }
   0xc   :  { %v65_v25 = vmul.f32 %v351_v14, %v351_v14  ;;  %v73_v26 = vsel %vm42_vm0, %v63_v13, 0.0  ;;  %v54_v30 = vsel %vm42_vm0, %v360_v21, 0.0  ;;  %v66_v31 = vmul.f32 %v360_v21, %v360_v21 }
   0xd   :  { %v49_v22 = vadd.f32 %v48_v12, %v47_v15  ;;  %v72_v29 = vadd.f32 %v71_v20, %v70_v23  ;;  %v75_v32 = vsel %vm42_vm0, %v64_v18, 0.0  ;;  %v56_v35 = vsel %vm42_vm0, %v367_v27, 0.0  ;;  %v233_v51 = vpop.eup %232 }
   0xe   :  { %v77_v36 = vsel %vm42_vm0, %v65_v25, 0.0  ;;  %v67_v39 = vmul.f32 %v367_v27, %v367_v27  ;;  %v79_v40 = vsel %vm42_vm0, %v66_v31, 0.0  ;;  %v117_v48 = vrot.slane %v113_v46, 3  ;;  %v108_v25 = vld [vmem:[%s413_s1] sm:$0xf]  ;;  %s293_s1 = smov [#allocation5]  }
   0xf   :  { %v51_v28 = vadd.f32 %v50_v17, %v49_v22  ;;  %v74_v34 = vadd.f32 %v73_v26, %v72_v29  ;;  %v292_v50 = vmov 0   ;;  %v119_v52 = vrot.slane %v113_v46, 5 }
  0x10   :  { %v81_v44 = vsel %vm42_vm0, %v67_v39, 0.0  ;;  %v151_v49 = vperm.slane %v117_v48, 0  ;;  %231 = vset.pattern.permute.xlu1 %v292_v50  ;;  %229 = vset.pattern.permute.xlu2 %v292_v50  ;;  %v86_v53 = vmul.f32 256.0, %v233_v51  ;;  %v148_v57 = vperm.slane %v113_v46, 0 }
  0x11   :  { %v53_v33 = vadd.f32 %v52_v24, %v51_v28  ;;  %v76_v38 = vadd.f32 %v75_v32, %v74_v34  ;;  %230 = vset.pattern.permute.xlu0 %v292_v50  ;;  %v153_v54 = vperm.slane %v119_v52, 0  ;;  %v115_v59 = vrot.slane %v113_v46, 1 }
  0x12   :  { %169 = vperm.xlu1 %231, %v151_v49   ;;  %v87_v55 = vsub.f32 1.0, %v86_v53  ;;  %157 = vperm.xlu2 %229, %v148_v57   ;;  %vm90_vm1 = vweird.f32 %v233_v51  ;;  %v118_v4 = vrot.slane %v113_v46, 4  ;;  %v116_v11 = vrot.slane %v113_v46, 2 }
  0x13   :  { %v55_v37 = vadd.f32 %v54_v30, %v53_v33  ;;  %v78_v42 = vadd.f32 %v77_v36, %v76_v38  ;;  %v149_v61 = vperm.slane %v115_v59, 0  ;;  %v120_v15 = vrot.slane %v113_v46, 6  ;;  %v110_v30 = vld [vmem:[%s414_s2] sm:$0xf]  ;;  %s208_s2 = sshll.u32 %s293_s1, 4  ;;  %s209_s2 = int_to_ptr.vmem [resolvable:$true] %s208_s2 }
  0x14   :  { %v88_v56 = vmul.f32 %v233_v51, %v87_v55  ;;  %v152_v8 = vperm.slane %v118_v4, 0  ;;  %v150_v13 = vperm.slane %v116_v11, 0  ;;  %v121_v32 = vrot.slane %v113_v46, 7 }
  0x15   :  { %v57_v41 = vadd.f32 %v56_v35, %v55_v37  ;;  %v80_v43 = vadd.f32 %v79_v40, %v78_v42  ;;  %v154_v17 = vperm.slane %v120_v15, 0 }
  0x16   :  { %v89_v58 = vadd.f32 %v233_v51, %v88_v56  ;;  %v155_v33 = vperm.slane %v121_v32, 0 }
  0x17   :  { %58 = vadd.xlane.f32.xlu0 %v57_v41  ;;  %v82_v45 = vadd.f32 %v81_v44, %v80_v43 }
  0x18   :  { %v91_v62 = vsel %vm90_vm1, %v233_v51, %v89_v58 }
  0x1a   :  { %177 = vperm.xlu1 %231, %v153_v54   ;;  %161 = vperm.xlu2 %229, %v149_v61  }
  0x1f   :  { %83 = vadd.xlane.f32.xlu0 %v82_v45 }
  0x22   :  { %173 = vperm.xlu2 %229, %v152_v8  }
  0x2a   :  { %181 = vperm.xlu2 %229, %v154_v17  }
  0x33   :  { %165 = vperm.xlu0 %230, %v150_v13  }
  0x6c   :  { %v158_v35 = vpop.permute.xlu2 %157 }
  0x74   :  { %v162_v37 = vpop.permute.xlu2 %161 }
  0x7c   :  { %v174_v39 = vpop.permute.xlu2 %173 }
  0x84   :  { %v170_v34 = vpop.permute.xlu1 %169 }
  0x8a   :  { %v59_v60 = vpop.xlane.xlu0 %58 }
  0x8b   :  { %v92_v63 = vmul.f32 %v91_v62, %v59_v60 }
  0x8c   :  { %v178_v36 = vpop.permute.xlu1 %177 }
  0x8d   :  { %v94_v6 = vmul.f32 %v92_v63, %v92_v63 }
  0x92   :  { %v84_v5 = vpop.xlane.xlu0 %83 }
  0x93   :  { %v93_v7 = vmul.f32 %v91_v62, %v84_v5 }
  0x95   :  { %v95_v10 = vsub.f32 %v93_v7, %v94_v6 }
  0x97   :  { %v96_v12 = vmax.f32 %v95_v10, 0.0 }
  0x99   :  { %v97_v16 = vadd.f32 1e-05, %v96_v12 }
  0x9b   :  { %234 = vrsqrt.f32 %v97_v16  ;;  %vm104_vm3 = vweird.f32 %v97_v16 }
  0xa1   :  { %v235_v18 = vpop.eup %234 }
  0xa2   :  { %v99_v19 = vmul.f32 %v235_v18, %v97_v16  ;;  %vm105_vm2 = vweird.f32 %v235_v18 }
  0xa3   :  { %vm106_vm4 = vmor %vm104_vm3, %vm105_vm2 }
  0xa4   :  { %v100_v20 = vmul.f32 %v235_v18, %v99_v19 }
  0xa5   :  { %v166_v56 = vpop.permute.xlu0 %165 }
  0xa6   :  { %v101_v22 = vmul.f32 0.5, %v100_v20 }
  0xa8   :  { %v102_v23 = vsub.f32 1.5, %v101_v22 }
  0xaa   :  { %v103_v24 = vmul.f32 %v235_v18, %v102_v23 }
  0xac   :  { %v107_v26 = vsel %vm106_vm4, %v235_v18, %v103_v24 }
  0xad   :  { %v109_v28 = vmul.f32 %v108_v25, %v107_v26 }
  0xaf   :  { %124 = vperm.xlu1 %231, %v109_v28   ;;  %v111_v29 = vmul.f32 %v109_v28, %v92_v63 }
  0xb1   :  { %v112_v31 = vsub.f32 %v110_v30, %v111_v29 }
  0xb7   :  { %137 = vperm.xlu1 %231, %v112_v31  }
  0xbf   :  { %185 = vperm.xlu1 %231, %v155_v33  }
 0x121   :  { %v125_v38 = vpop.permute.xlu1 %124 }
 0x122   :  { %v127_v40 = vmul.f32 %v125_v38, %v325_v0  ;;  %v128_v41 = vmul.f32 %v125_v38, %v327_v1  ;;  %v130_v42 = vmul.f32 %v125_v38, %v331_v3  ;;  %v131_v43 = vmul.f32 %v125_v38, %v343_v9  ;;  %v182_v9 = vpop.permute.xlu2 %181 }
 0x123   :  { %v132_v44 = vmul.f32 %v125_v38, %v351_v14  ;;  %v133_v45 = vmul.f32 %v125_v38, %v360_v21  ;;  %v129_v47 = vmul.f32 %v125_v38, %v329_v2  ;;  %v134_v14 = vmul.f32 %v125_v38, %v367_v27 }
 0x129   :  { %v138_v46 = vpop.permute.xlu1 %137 }
 0x12a   :  { %v140_v48 = vadd.f32 %v138_v46, %v127_v40  ;;  %v141_v49 = vadd.f32 %v138_v46, %v128_v41  ;;  %v143_v50 = vadd.f32 %v138_v46, %v130_v42  ;;  %v144_v51 = vadd.f32 %v138_v46, %v131_v43 }
 0x12b   :  { %v145_v52 = vadd.f32 %v138_v46, %v132_v44  ;;  %v146_v53 = vadd.f32 %v138_v46, %v133_v45  ;;  %v142_v55 = vadd.f32 %v138_v46, %v129_v47  ;;  %v147_v58 = vadd.f32 %v138_v46, %v134_v14 }
 0x12c   :  { %v188_v0 = vmul.f32 %v158_v35, %v140_v48  ;;  %v189_v54 = vmul.f32 %v162_v37, %v141_v49  ;;  %v191_v1 = vmul.f32 %v170_v34, %v143_v50  ;;  %v192_v3 = vmul.f32 %v174_v39, %v144_v51 }
 0x12d   :  { %v193_v57 = vmul.f32 %v178_v36, %v145_v52  ;;  %v194_v21 = vmul.f32 %v182_v9, %v146_v53  ;;  %v190_v2 = vmul.f32 %v166_v56, %v142_v55 }
 0x12e   :  { %196 = vst.msk [vmem:[#allocation5] sm:$0xf] %vm42_vm0, %v188_v0 }
 0x12f   :  { %197 = vst.msk [vmem:[#allocation5 + $0x4] sm:$0xf] %vm42_vm0, %v189_v54 }
 0x130   :  { %199 = vst.msk [vmem:[#allocation5 + $0xc] sm:$0xf] %vm42_vm0, %v191_v1 }
 0x131   :  { %200 = vst.msk [vmem:[#allocation5 + $0x10] sm:$0xf] %vm42_vm0, %v192_v3  ;;  %v186_v59 = vpop.permute.xlu1 %185 }
 0x132   :  { %201 = vst.msk [vmem:[#allocation5 + $0x14] sm:$0xf] %vm42_vm0, %v193_v57  ;;  %v195_v60 = vmul.f32 %v186_v59, %v147_v58 }
 0x133   :  { %202 = vst.msk [vmem:[#allocation5 + $0x18] sm:$0xf] %vm42_vm0, %v194_v21 }
 0x134   :  { %198 = vst.msk [vmem:[#allocation5 + $0x8] sm:$0xf] %vm42_vm0, %v190_v2 }
 0x135   :  { %203 = vst.msk [vmem:[#allocation5 + $0x1c] sm:$0xf] %vm42_vm0, %v195_v60 }
 0x136   :  { %216 = dma.vmem_to_hbm [thread:$0]  %s209_s2, 512, %s211_s28, [#allocation4], %s289_s20, %s289_s20, %s290_s21  }
 0x137   :  { %286 = dma.done.wait [#allocation4], 512  }
 0x138   :  { %287 = vsyncadd [#allocation4], 4294966784 }
 0x139   :  { %221 = vsyncpa [#allocation3], 1 }
 0x13a   :  { %222 = vsyncpa [#allocation4], 1 }

</bundles_post_ra>
